<compile_context>
chip_gen: v6e
topology: v6e:2x2x1
jax: 0.10.0
libtpu: 0.0.40
codegen_flags: <defaults>
</compile_context>

<pallas_src>
import functools

import jax
import jax.numpy as jnp
from jax.experimental import pallas as pl
from jax.experimental.pallas import tpu as pltpu

_LANE = 128
_SUB = 8
_TILE_ROWS = 8192          # (8192,128) f32 = 4 MiB per block
_NCORES = 2                # v7x: 2 TensorCores; on v5e/v6e the extra axis runs serially
_VMEM_LIMIT = 32 << 20     # raises v5e's 16 MiB scoped default; well under v7x's 64 MiB


def _to_slab(x):
    """Flatten (native dtype, no host upcast) and view as a sublane-dense (rows, 128) slab.

    rows is a multiple of 8.  When len(x) is already a multiple of 1024 the reshape is free
    (no copy); otherwise a zero pad (full copy) is still required.
    TODO(synk): producers should hand over 1024-aligned buffers so the pad copy disappears.
    """
    x = jnp.asarray(x).reshape(-1)
    n = x.shape[0]
    rows = ((pl.cdiv(n, _LANE) + _SUB - 1) // _SUB) * _SUB
    if rows * _LANE != n:
        x = jnp.pad(x, (0, rows * _LANE - n))
    return x.reshape(rows, _LANE), n


def _sublane_multiple(*slabs):
    # Native sublane tiling per dtype: f32 -> 8, bf16 -> 16, int8/bool -> 32.
    return max(32 // s.dtype.itemsize for s in slabs)


def _grid_geometry(rows, tile_rows, sublane_multiple):
    """Pick (tile_rows, n_tiles, cores, tiles_per_core) for a (rows, 128) slab."""
    m = max(_SUB, sublane_multiple)
    cores = _NCORES if rows >= _NCORES * m else 1
    share = pl.cdiv(pl.cdiv(rows, cores), m) * m      # per-core rows, tiling-aligned
    tr = min(tile_rows, share)
    if tr >= rows:                                    # single full-array block
        return rows, 1, 1, 1
    n_tiles = pl.cdiv(rows, tr)
    cores = min(cores, n_tiles)
    return tr, n_tiles, cores, pl.cdiv(n_tiles, cores)


def _partial_specs(tr, t_last, tpc, n_in):
    """Input/output BlockSpecs shared by both reduction kernels."""
    # Clamp phantom block indices (2-core split, odd tile count) into range; the kernel
    # fully masks their contribution, so re-reading the last real block is safe.
    data_map = lambda c, i: (jnp.minimum(c * tpc + i, t_last), 0)
    in_specs = [pl.BlockSpec(memory_space=pltpu.MemorySpace.SMEM)]   # runtime element count
    in_specs += [pl.BlockSpec((tr, _LANE), data_map) for _ in range(n_in)]
    out_spec = pl.BlockSpec((_SUB, _LANE), lambda c, i: (c, 0))      # per-core partial slab
    return in_specs, out_spec


def _tile_sum(x):
    # (tr,128) -> (8,128).  Leading-dim reshape preserves the (8,128) tiling (free);
    # the sum over axis 0 is pure VALU vreg adds (no cross-lane XLU reduce per step).
    return x.reshape(-1, _SUB, _LANE).sum(axis=0)


# ---------------------------------------------------------------------------
# Kernel 1: BCE (sum, normalized on host) + correct count.
# ---------------------------------------------------------------------------
def _bce_count_kernel(n_ref, p_ref, y_ref, loss_ref, cnt_ref, *, binary_labels):
    c, i = pl.program_id(0), pl.program_id(1)
    gt = c * pl.num_programs(1) + i                 # global tile index

    @pl.when(i == 0)
    def _():
        loss_ref[...] = jnp.zeros_like(loss_ref)
        cnt_ref[...] = jnp.zeros_like(cnt_ref)

    p = p_ref[...].astype(jnp.float32)
    y = y_ref[...].astype(jnp.float32)

    if binary_labels:
        # One EUP log per element (halves transcendental pushes); exact for 0/1 labels.
        sel = jnp.where(y >= 0.5, p, 1.0 - p)
        bce = -jnp.maximum(jnp.log(sel), -100.0)
    else:
        # Exact torch.nn.BCELoss formula (log terms clamped at -100); supports soft labels.
        log_p = jnp.maximum(jnp.log(p), -100.0)
        log_1mp = jnp.maximum(jnp.log(1.0 - p), -100.0)
        bce = -(y * log_p + (1.0 - y) * log_1mp)
    hit = (jnp.abs(p - y) < 0.5).astype(jnp.float32)

    tr = p.shape[0]
    n = n_ref[0]
    ragged = (gt + 1) * (tr * _LANE) > n            # padded / partially-OOB / phantom tile

    @pl.when(jnp.logical_not(ragged))
    def _():                                        # steady state: no per-element masking
        loss_ref[...] += _tile_sum(bce)
        cnt_ref[...] += _tile_sum(hit)

    @pl.when(ragged)
    def _():
        row = jax.lax.broadcasted_iota(jnp.int32, p.shape, 0)
        lane = jax.lax.broadcasted_iota(jnp.int32, p.shape, 1)
        valid = (gt * tr + row) * _LANE + lane < n
        loss_ref[...] += _tile_sum(jnp.where(valid, bce, 0.0))
        cnt_ref[...] += _tile_sum(jnp.where(valid, hit, 0.0))


def bce_and_count(probs, labels, *, binary_labels=False, tile_rows=_TILE_ROWS):
    """Returns (mean BCE loss f32, correct count int32).  Inputs keep their dtype."""
    labels = jnp.asarray(labels).reshape(-1)
    probs = jnp.asarray(probs).reshape(labels.shape)
    p2d, n = _to_slab(probs)
    y2d, _ = _to_slab(labels)
    assert n < 2 ** 30, "in-kernel flat-index / tile-end math is int32"
    rows = p2d.shape[0]
    tr, n_tiles, cores, tpc = _grid_geometry(rows, tile_rows, _sublane_multiple(p2d, y2d))
    in_specs, out_spec = _partial_specs(tr, n_tiles - 1, tpc, n_in=2)

    loss_p, cnt_p = pl.pallas_call(
        functools.partial(_bce_count_kernel, binary_labels=binary_labels),
        grid=(cores, tpc),
        in_specs=in_specs,
        out_specs=(out_spec, out_spec),
        out_shape=(
            jax.ShapeDtypeStruct((cores * _SUB, _LANE), jnp.float32),
            jax.ShapeDtypeStruct((cores * _SUB, _LANE), jnp.float32),
        ),
        compiler_params=pltpu.CompilerParams(
            dimension_semantics=("parallel", "arbitrary"),
            vmem_limit_bytes=_VMEM_LIMIT,
        ),
    )(jnp.full((1,), n, jnp.int32), p2d, y2d)

    loss = jnp.sum(loss_p) / jnp.float32(n)
    # Per-cell counts are exact in f32 (each cell <= tiles_per_core << 2^24); total in int32.
    count = jnp.sum(cnt_p.astype(jnp.int32))
    return loss, count


# ---------------------------------------------------------------------------
# Kernel 2: sum of squares of one weight tensor (per-tensor launch; no concat).
# ---------------------------------------------------------------------------
def _ssq_kernel(n_ref, w_ref, out_ref):
    c, i = pl.program_id(0), pl.program_id(1)
    gt = c * pl.num_programs(1) + i

    @pl.when(i == 0)
    def _():
        out_ref[...] = jnp.zeros_like(out_ref)

    w = w_ref[...].astype(jnp.float32)
    sq = w * w
    tr = w.shape[0]
    n = n_ref[0]
    ragged = (gt + 1) * (tr * _LANE) > n

    @pl.when(jnp.logical_not(ragged))
    def _():
        out_ref[...] += _tile_sum(sq)

    @pl.when(ragged)
    def _():
        # Zero padding already contributes 0; the mask only guards OOB / phantom reads.
        row = jax.lax.broadcasted_iota(jnp.int32, w.shape, 0)
        lane = jax.lax.broadcasted_iota(jnp.int32, w.shape, 1)
        valid = (gt * tr + row) * _LANE + lane < n
        out_ref[...] += _tile_sum(jnp.where(valid, sq, 0.0))


def sum_of_squares(w, *, tile_rows=_TILE_ROWS):
    w2d, n = _to_slab(w)
    assert n < 2 ** 30
    rows = w2d.shape[0]
    tr, n_tiles, cores, tpc = _grid_geometry(rows, tile_rows, _sublane_multiple(w2d))
    in_specs, out_spec = _partial_specs(tr, n_tiles - 1, tpc, n_in=1)
    out = pl.pallas_call(
        _ssq_kernel,
        grid=(cores, tpc),
        in_specs=in_specs,
        out_specs=out_spec,
        out_shape=jax.ShapeDtypeStruct((cores * _SUB, _LANE), jnp.float32),
        compiler_params=pltpu.CompilerParams(
            dimension_semantics=("parallel", "arbitrary"),
            vmem_limit_bytes=_VMEM_LIMIT,
        ),
    )(jnp.full((1,), n, jnp.int32), w2d)
    return jnp.sum(out)


def regularization_term(regular_weights_list, regular_factor_list, batch_size):
    """sum_p factor_p/(2*batch_size) * sum_t sum(w_{p,t}^2); scalar combine on the host."""
    total = jnp.float32(0.0)
    for part_weights, factor in zip(regular_weights_list, regular_factor_list):
        part = jnp.float32(0.0)
        for w in part_weights:
            part = part + sum_of_squares(w)
        total = total + jnp.float32(factor) * part / jnp.float32(2 * batch_size)
    return total


def bicelo_forward(model_outputs, labels, *, batch_size, regular_flag,
                   regular_weights_list, regular_factor_list, binary_labels=False):
    # TODO(synk): for tiny label vectors (the common BiCELo case) launch overhead dominates;
    # a single fused pallas_call (or plain jnp) would be faster there.
    result, correct_count = bce_and_count(model_outputs, labels, binary_labels=binary_labels)
    if regular_flag and regular_weights_list:
        result = result + regularization_term(
            regular_weights_list, regular_factor_list, batch_size)
    return result, correct_count


if __name__ == "__main__":
    key = jax.random.PRNGKey(0)
    k1, k2, k3, k4, k5, k6 = jax.random.split(key, 6)

    # ---- Test 1: BiCELo-shaped small inputs (batch of scalar predictions). ----
    N = 8
    model_outputs = jax.nn.sigmoid(jax.random.normal(k1, (N, 1), jnp.float32))
    labels_f32 = jax.random.bernoulli(k2, 0.5, (N,)).astype(jnp.float32)
    labels = labels_f32.astype(jnp.bfloat16)        # narrow label feed (lossless for 0/1)

    part1_weight = 0.02 * jax.random.normal(k3, (32, 16), jnp.float32)
    part2_weight = 0.02 * jax.random.normal(k4, (16, 4), jnp.float32)
    regular_weights_list = [[part1_weight], [part2_weight]]   # bias filtering done host-side
    regular_factor_list = [0.01, 0.001]

    result, correct_count = bicelo_forward(
        model_outputs, labels,
        batch_size=N,
        regular_flag=True,
        regular_weights_list=regular_weights_list,
        regular_factor_list=regular_factor_list,
        binary_labels=True,
    )
    result = jax.block_until_ready(result)
    correct_count = jax.block_until_ready(correct_count)

    p = model_outputs.reshape(labels_f32.shape)
    bce_ref = jnp.mean(-(labels_f32 * jnp.maximum(jnp.log(p), -100.0)
                         + (1.0 - labels_f32) * jnp.maximum(jnp.log(1.0 - p), -100.0)))
    reg_ref = sum(f * jnp.sum(w ** 2) / (2 * N)
                  for (w,), f in zip(regular_weights_list, regular_factor_list))
    result_ref = bce_ref + reg_ref
    count_ref = int(jnp.sum(jnp.abs(p - labels_f32) < 0.5))
    assert jnp.allclose(result, result_ref, rtol=1e-5, atol=1e-6), (result, result_ref)
    assert int(correct_count) == count_ref, (correct_count, count_ref)

    # ---- Test 2: multi-tile / 2-core / ragged-tail / phantom-tile path (small tiles). ----
    N2 = 5000
    p2 = jax.nn.sigmoid(jax.random.normal(k5, (N2,), jnp.float32))
    y2 = jax.random.bernoulli(k6, 0.5, (N2,)).astype(jnp.float32)
    loss2, cnt2 = bce_and_count(p2, y2, binary_labels=False, tile_rows=16)
    loss2 = jax.block_until_ready(loss2)
    bce2_ref = jnp.mean(-(y2 * jnp.maximum(jnp.log(p2), -100.0)
                          + (1.0 - y2) * jnp.maximum(jnp.log(1.0 - p2), -100.0)))
    cnt2_ref = int(jnp.sum(jnp.abs(p2 - y2) < 0.5))
    assert jnp.allclose(loss2, bce2_ref, rtol=1e-5, atol=1e-6), (loss2, bce2_ref)
    assert int(cnt2) == cnt2_ref, (int(cnt2), cnt2_ref)

    print("KERNEL_OK")
</pallas_src>

<mosaic_0001>
module attributes {stable_mosaic.version = 11 : i64} {
  func.func @_bce_count_kernel(%arg0: i32, %arg1: i32, %arg2: memref<1xi32, #tpu.memory_space<smem>>, %arg3: memref<8x128xf32, #tpu.memory_space<vmem>>, %arg4: memref<8x128xbf16, #tpu.memory_space<vmem>>, %arg5: memref<8x128xf32, #tpu.memory_space<vmem>>, %arg6: memref<8x128xf32, #tpu.memory_space<vmem>>) attributes {dimension_semantics = [#tpu.dimension_semantics<parallel>, #tpu.dimension_semantics<arbitrary>], iteration_bounds = array<i64: 1, 1>, scalar_prefetch = 0 : i64, scratch_operands = 0 : i64, tpu.core_type = #tpu.core_type<tc>, window_params = [{transform_indices = @transform_0, window_bounds = array<i64: 1>}, {transform_indices = @transform_1, window_bounds = array<i64: 8, 128>}, {transform_indices = @transform_2, window_bounds = array<i64: 8, 128>}, {transform_indices = @transform_3, window_bounds = array<i64: 8, 128>}, {transform_indices = @transform_4, window_bounds = array<i64: 8, 128>}]} {
    %c1_i32 = arith.constant 1 : i32
    %0 = arith.muli %arg0, %c1_i32 : i32
    %1 = arith.addi %0, %arg1 : i32
    %c0_i32 = arith.constant 0 : i32
    %2 = arith.cmpi eq, %arg1, %c0_i32 : i32
    %3 = arith.extui %2 : i1 to i32
    %c0_i32_0 = arith.constant 0 : i32
    %4 = arith.cmpi ne, %3, %c0_i32_0 : i32
    scf.if %4 {
      %cst_12 = arith.constant 0.000000e+00 : f32
      %33 = vector.broadcast %cst_12 : f32 to vector<8x128xf32>
      %c0_13 = arith.constant 0 : index
      %c0_14 = arith.constant 0 : index
      %34 = vector.load %arg5[%c0_13, %c0_14] : memref<8x128xf32, #tpu.memory_space<vmem>>, vector<8x128xf32>
      tpu.vector_store %arg5[%c0_13, %c0_14], %33 {strides = array<i32>} : memref<8x128xf32, #tpu.memory_space<vmem>>, vector<8x128xf32>,
      %cst_15 = arith.constant 0.000000e+00 : f32
      %35 = vector.broadcast %cst_15 : f32 to vector<8x128xf32>
      %c0_16 = arith.constant 0 : index
      %c0_17 = arith.constant 0 : index
      %36 = vector.load %arg6[%c0_16, %c0_17] : memref<8x128xf32, #tpu.memory_space<vmem>>, vector<8x128xf32>
      tpu.vector_store %arg6[%c0_16, %c0_17], %35 {strides = array<i32>} : memref<8x128xf32, #tpu.memory_space<vmem>>, vector<8x128xf32>,
    } else {
    }
    %c0 = arith.constant 0 : index
    %c0_1 = arith.constant 0 : index
    %5 = vector.load %arg3[%c0, %c0_1] : memref<8x128xf32, #tpu.memory_space<vmem>>, vector<8x128xf32>
    %c0_2 = arith.constant 0 : index
    %c0_3 = arith.constant 0 : index
    %6 = vector.load %arg4[%c0_2, %c0_3] : memref<8x128xbf16, #tpu.memory_space<vmem>>, vector<8x128xbf16>
    %7 = arith.extf %6 : vector<8x128xbf16> to vector<8x128xf32>
    %cst = arith.constant 5.000000e-01 : f32
    %8 = vector.broadcast %cst : f32 to vector<8x128xf32>
    %9 = arith.cmpf oge, %7, %8 : vector<8x128xf32>
    %cst_4 = arith.constant 1.000000e+00 : f32
    %10 = vector.broadcast %cst_4 : f32 to vector<8x128xf32>
    %11 = arith.subf %10, %5 : vector<8x128xf32>
    %12 = arith.select %9, %5, %11 : vector<8x128xi1>, vector<8x128xf32>
    %13 = math.log %12 : vector<8x128xf32>
    %cst_5 = arith.constant -1.000000e+02 : f32
    %14 = vector.broadcast %cst_5 : f32 to vector<8x128xf32>
    %15 = arith.maximumf %13, %14 : vector<8x128xf32>
    %cst_6 = arith.constant 0.000000e+00 : f32
    %16 = vector.broadcast %cst_6 : f32 to vector<8x128xf32>
    %17 = arith.subf %16, %15 : vector<8x128xf32>
    %18 = arith.subf %5, %7 : vector<8x128xf32>
    %19 = math.absf %18 : vector<8x128xf32>
    %cst_7 = arith.constant 5.000000e-01 : f32
    %20 = vector.broadcast %cst_7 : f32 to vector<8x128xf32>
    %21 = arith.cmpf olt, %19, %20 : vector<8x128xf32>
    %22 = arith.extui %21 : vector<8x128xi1> to vector<8x128xi32>
    %23 = arith.sitofp %22 : vector<8x128xi32> to vector<8x128xf32>
    %c0_8 = arith.constant 0 : index
    %24 = memref.load %arg2[%c0_8] : memref<1xi32, #tpu.memory_space<smem>>
    %c1_i32_9 = arith.constant 1 : i32
    %25 = arith.addi %1, %c1_i32_9 : i32
    %c1024_i32 = arith.constant 1024 : i32
    %26 = arith.muli %25, %c1024_i32 : i32
    %27 = arith.cmpi sgt, %26, %24 : i32
    %true = arith.constant true
    %28 = arith.xori %27, %true : i1
    %29 = arith.extui %28 : i1 to i32
    %c0_i32_10 = arith.constant 0 : i32
    %30 = arith.cmpi ne, %29, %c0_i32_10 : i32
    scf.if %30 {
      %c0_12 = arith.constant 0 : index
      %c0_13 = arith.constant 0 : index
      %33 = vector.load %arg5[%c0_12, %c0_13] : memref<8x128xf32, #tpu.memory_space<vmem>>, vector<8x128xf32>
      %34 = vector.shape_cast %17 : vector<8x128xf32> to vector<1x8x128xf32>
      %cst_14 = arith.constant dense<0.000000e+00> : vector<8x128xf32>
      %35 = vector.multi_reduction <add>, %34, %cst_14 [0] : vector<1x8x128xf32> to vector<8x128xf32>
      %36 = arith.addf %33, %35 : vector<8x128xf32>
      %c0_15 = arith.constant 0 : index
      %c0_16 = arith.constant 0 : index
      %37 = vector.load %arg5[%c0_15, %c0_16] : memref<8x128xf32, #tpu.memory_space<vmem>>, vector<8x128xf32>
      tpu.vector_store %arg5[%c0_15, %c0_16], %36 {strides = array<i32>} : memref<8x128xf32, #tpu.memory_space<vmem>>, vector<8x128xf32>,
      %c0_17 = arith.constant 0 : index
      %c0_18 = arith.constant 0 : index
      %38 = vector.load %arg6[%c0_17, %c0_18] : memref<8x128xf32, #tpu.memory_space<vmem>>, vector<8x128xf32>
      %39 = vector.shape_cast %23 : vector<8x128xf32> to vector<1x8x128xf32>
      %cst_19 = arith.constant dense<0.000000e+00> : vector<8x128xf32>
      %40 = vector.multi_reduction <add>, %39, %cst_19 [0] : vector<1x8x128xf32> to vector<8x128xf32>
      %41 = arith.addf %38, %40 : vector<8x128xf32>
      %c0_20 = arith.constant 0 : index
      %c0_21 = arith.constant 0 : index
      %42 = vector.load %arg6[%c0_20, %c0_21] : memref<8x128xf32, #tpu.memory_space<vmem>>, vector<8x128xf32>
      tpu.vector_store %arg6[%c0_20, %c0_21], %41 {strides = array<i32>} : memref<8x128xf32, #tpu.memory_space<vmem>>, vector<8x128xf32>,
    } else {
    }
    %31 = arith.extui %27 : i1 to i32
    %c0_i32_11 = arith.constant 0 : i32
    %32 = arith.cmpi ne, %31, %c0_i32_11 : i32
    scf.if %32 {
      %33 = tpu.iota {dimensions = array<i32: 0>} : vector<8x128xi32>
      %34 = tpu.iota {dimensions = array<i32: 1>} : vector<8x128xi32>
      %c8_i32 = arith.constant 8 : i32
      %35 = arith.muli %1, %c8_i32 : i32
      %36 = vector.broadcast %35 : i32 to vector<8x128xi32>
      %37 = arith.addi %36, %33 : vector<8x128xi32>
      %c128_i32 = arith.constant 128 : i32
      %38 = vector.broadcast %c128_i32 : i32 to vector<8x128xi32>
      %39 = arith.muli %37, %38 : vector<8x128xi32>
      %40 = arith.addi %39, %34 : vector<8x128xi32>
      %41 = vector.broadcast %24 : i32 to vector<8x128xi32>
      %42 = arith.cmpi slt, %40, %41 : vector<8x128xi32>
      %c0_12 = arith.constant 0 : index
      %c0_13 = arith.constant 0 : index
      %43 = vector.load %arg5[%c0_12, %c0_13] : memref<8x128xf32, #tpu.memory_space<vmem>>, vector<8x128xf32>
      %cst_14 = arith.constant 0.000000e+00 : f32
      %44 = vector.broadcast %cst_14 : f32 to vector<8x128xf32>
      %45 = arith.select %42, %17, %44 : vector<8x128xi1>, vector<8x128xf32>
      %46 = vector.shape_cast %45 : vector<8x128xf32> to vector<1x8x128xf32>
      %cst_15 = arith.constant dense<0.000000e+00> : vector<8x128xf32>
      %47 = vector.multi_reduction <add>, %46, %cst_15 [0] : vector<1x8x128xf32> to vector<8x128xf32>
      %48 = arith.addf %43, %47 : vector<8x128xf32>
      %c0_16 = arith.constant 0 : index
      %c0_17 = arith.constant 0 : index
      %49 = vector.load %arg5[%c0_16, %c0_17] : memref<8x128xf32, #tpu.memory_space<vmem>>, vector<8x128xf32>
      tpu.vector_store %arg5[%c0_16, %c0_17], %48 {strides = array<i32>} : memref<8x128xf32, #tpu.memory_space<vmem>>, vector<8x128xf32>,
      %c0_18 = arith.constant 0 : index
      %c0_19 = arith.constant 0 : index
      %50 = vector.load %arg6[%c0_18, %c0_19] : memref<8x128xf32, #tpu.memory_space<vmem>>, vector<8x128xf32>
      %cst_20 = arith.constant 0.000000e+00 : f32
      %51 = vector.broadcast %cst_20 : f32 to vector<8x128xf32>
      %52 = arith.select %42, %23, %51 : vector<8x128xi1>, vector<8x128xf32>
      %53 = vector.shape_cast %52 : vector<8x128xf32> to vector<1x8x128xf32>
      %cst_21 = arith.constant dense<0.000000e+00> : vector<8x128xf32>
      %54 = vector.multi_reduction <add>, %53, %cst_21 [0] : vector<1x8x128xf32> to vector<8x128xf32>
      %55 = arith.addf %50, %54 : vector<8x128xf32>
      %c0_22 = arith.constant 0 : index
      %c0_23 = arith.constant 0 : index
      %56 = vector.load %arg6[%c0_22, %c0_23] : memref<8x128xf32, #tpu.memory_space<vmem>>, vector<8x128xf32>
      tpu.vector_store %arg6[%c0_22, %c0_23], %55 {strides = array<i32>} : memref<8x128xf32, #tpu.memory_space<vmem>>, vector<8x128xf32>,
    } else {
    }
    return
  }
  func.func @transform_0(%arg0: i32, %arg1: i32) -> i32 {
    %c0_i32 = arith.constant 0 : i32
    %c0_i32_0 = arith.constant 0 : i32
    return %c0_i32 : i32
  }
  func.func @transform_1(%arg0: i32, %arg1: i32) -> (i32, i32) {
    %c1_i32 = arith.constant 1 : i32
    %0 = arith.muli %arg0, %c1_i32 : i32
    %1 = arith.addi %0, %arg1 : i32
    %c0_i32 = arith.constant 0 : i32
    %2 = arith.minsi %1, %c0_i32 : i32
    %c0_i32_0 = arith.constant 0 : i32
    %c0_i32_1 = arith.constant 0 : i32
    return %2, %c0_i32_0 : i32, i32
  }
  func.func @transform_2(%arg0: i32, %arg1: i32) -> (i32, i32) {
    %c1_i32 = arith.constant 1 : i32
    %0 = arith.muli %arg0, %c1_i32 : i32
    %1 = arith.addi %0, %arg1 : i32
    %c0_i32 = arith.constant 0 : i32
    %2 = arith.minsi %1, %c0_i32 : i32
    %c0_i32_0 = arith.constant 0 : i32
    %c0_i32_1 = arith.constant 0 : i32
    return %2, %c0_i32_0 : i32, i32
  }
  func.func @transform_3(%arg0: i32, %arg1: i32) -> (i32, i32) {
    %c0_i32 = arith.constant 0 : i32
    %c0_i32_0 = arith.constant 0 : i32
    return %arg0, %c0_i32 : i32, i32
  }
  func.func @transform_4(%arg0: i32, %arg1: i32) -> (i32, i32) {
    %c0_i32 = arith.constant 0 : i32
    %c0_i32_0 = arith.constant 0 : i32
    return %arg0, %c0_i32 : i32, i32
  }
}

</mosaic_0001>

<bundles_post_ra>
// kernel: tpu_custom_call.1
= control target key start
LH: loop header
LB: loop body
LE: loop exit
PB: predicated region body
PF: predicated region fallthrough
CT: control target
= control target key end

     0   :  { %11 = vsyncpa [#allocation4], 0  ;;  %s306_s0 = inlined_call_operand.<no memory space> [shape: s32[1], index: 0, kind: input, shape index: {}]   ;;  %s307_s1 = inlined_call_operand.hbm [shape: f32[8,128], index: 1, kind: input, shape index: {}]   ;;  %s308_s2 = inlined_call_operand.hbm [shape: bf16[8,128], index: 2, kind: input, shape index: {}]   ;;  %s309_s3 = inlined_call_operand.hbm [shape: f32[8,128], index: 3, kind: output, shape index: {0}]   ;;  %s310_s4 = inlined_call_operand.hbm [shape: f32[8,128], index: 4, kind: output, shape index: {1}]  }
   0x1   :  { %12 = vsyncpa [#allocation7], 0 }
   0x2   :  { %13 = vsyncpa [#allocation5], 0 }
   0x3   :  { %14 = vsyncpa [#allocation10], 0  ;;  %s255_s15 = smov [#allocation3]   ;;  %s256_s17 = smov [#allocation6]  }
   0x4   :  { %s28_s16 = sshll.u32 %s255_s15, 4  ;;  %s43_s18 = sshll.u32 %s256_s17, 4  ;;  %s29_s16 = int_to_ptr.vmem [resolvable:$true] %s28_s16  ;;  %s44_s18 = int_to_ptr.vmem [resolvable:$true] %s43_s18 }
   0x5   :  { %s175_s19 = scalar_lea.vmem %s29_s16, 128  ;;  %p180_p1 = scmp.lt.s32.totalorder %s29_s16, %s29_s16 }
   0x6   :  { %p176_p0 = scmp.ne.s32.totalorder %s29_s16, %s175_s19  ;;  %p181_p2 = scmp.lt.s32.totalorder %s175_s19, %s175_s19 }
   0x8   :  { %p182_p3 = por %p181_p2, %p180_p1 }
   0xa   :  { %p183_p4 = pnand %p182_p3, %p176_p0 }
   0xc   :  { %186 = shalt.err (!%p183_p4)
}
   0xd   :  { %31 = dma.hbm_to_vmem [thread:$0]  %s307_s1, 128, %s29_s16, [#allocation4]  }
   0xe   :  { %s195_s22 = scalar_lea.vmem %s44_s18, 64  ;;  %p200_p6 = scmp.lt.s32.totalorder %s44_s18, %s44_s18 }
   0xf   :  { %p196_p5 = scmp.ne.s32.totalorder %s44_s18, %s195_s22  ;;  %p201_p7 = scmp.lt.s32.totalorder %s195_s22, %s195_s22 }
  0x11   :  { %p202_p8 = por %p201_p7, %p200_p6 }
  0x13   :  { %p203_p9 = pnand %p202_p8, %p196_p5 }
  0x15   :  { %206 = shalt.err (!%p203_p9)
}
  0x16   :  { %46 = dma.hbm_to_vmem [thread:$0]  %s308_s2, 64, %s44_s18, [#allocation7]  }
  0x17   :  { %247 = dma.done.wait [#allocation4], 128  }
  0x18   :  { %248 = vsyncadd [#allocation4], 4294967168 }
  0x19   :  { %249 = dma.done.wait [#allocation7], 64  }
  0x1a   :  { %250 = vsyncadd [#allocation7], 4294967232  ;;  %v257_v0 = vmov 0.0   ;;  %v66_v1 = vld [vmem:[#allocation3] sm:$0xff]  ;;  %v67_v2 = vld [vmem:[#allocation6] sm:$0xf] }
  0x1b   :  { %64 = vst [vmem:[#allocation8] sm:$0xff] %v257_v0  ;;  %65 = vst [vmem:[#allocation9] sm:$0xff] %v257_v0  ;;  %v68_v3 = vunpack.c.l.bf16 %v67_v2  ;;  %v70_v4 = vsub.f32 1.0, %v66_v1  ;;  %p158_p10 = scmp.lt.s32.totalorder %s306_s0, 1024 }
  0x1d   :  { %vm69_vm0 = vcmp.ge.f32.partialorder %v68_v3, 0.5  ;;  %v76_v5 = vsub.f32 %v66_v1, %v68_v3 }
  0x1e   :  { %v71_v6 = vsel %vm69_vm0, %v66_v1, %v70_v4 }
  0x1f   :  { %165 = vlog2.f32 %v71_v6  ;;  %v77_v7 = vand.u32 2147483647, %v76_v5 }
  0x21   :  { %vm78_vm1 = vcmp.lt.f32.partialorder %v77_v7, 0.5 }
  0x22   :  { %v155_v8 = vsel %vm78_vm1, 1.0, %v257_v0 }
  0x2c   :  { %v166_v9 = vpop.eup %165 }
  0x2d   :  { %v73_v10 = vmul.f32 0.6931472, %v166_v9  ;;  %88 = sbr.rel (%p158_p10) target bundleno = 54 (0x36), region = 29 }
  0x2f   :  { %v74_v11 = vmax.f32 %v73_v10, -100.0 }
  0x31   :  { %v75_v12 = vsub.f32 0.0, %v74_v11 }
  0x32   :  { %v89_v13 = vld [vmem:[#allocation8] sm:$0xff]  ;;  %v93_v14 = vld [vmem:[#allocation9] sm:$0xff] }
  0x33   :  { %v91_v15 = vadd.f32 %v89_v13, %v75_v12  ;;  %v95_v16 = vadd.f32 %v155_v8, %v93_v14 }
  0x35   :  { %92 = vst [vmem:[#allocation8] sm:$0xff] %v91_v15  ;;  %96 = vst [vmem:[#allocation9] sm:$0xff] %v95_v16 }
  0x36 PF:  { %p159_p11 = scmp.ge.s32.totalorder %s306_s0, 1024 }
  0x38   :  { %99 = sbr.rel (%p159_p11) target bundleno = 74 (0x4a), region = 33 }
  0x3d   :  { %v100_v17 = vlaneseq  ;;  %v109_v21 = vstv %s306_s0  ;;  %v111_v23 = vld [vmem:[#allocation8] sm:$0xff]  ;;  %v116_v24 = vld [vmem:[#allocation9] sm:$0xff] }
  0x3f   :  { %v101_v18 = vshrl.u32 %v100_v17, 7  ;;  %v103_v19 = vand.u32 127, %v100_v17 }
  0x41   :  { %v107_v20 = vmul.u32 128, %v101_v18 }
  0x43   :  { %v108_v22 = vadd.s32 %v107_v20, %v103_v19 }
  0x45   :  { %vm110_vm2 = vcmp.lt.s32.totalorder %v108_v22, %v109_v21 }
  0x46   :  { %v112_v25 = vsel %vm110_vm2, %v75_v12, 0.0  ;;  %v117_v26 = vsel %vm110_vm2, %v155_v8, 0.0 }
  0x47   :  { %v114_v27 = vadd.f32 %v112_v25, %v111_v23  ;;  %v119_v28 = vadd.f32 %v117_v26, %v116_v24 }
  0x49   :  { %115 = vst [vmem:[#allocation8] sm:$0xff] %v114_v27  ;;  %120 = vst [vmem:[#allocation9] sm:$0xff] %v119_v28 }
  0x4a PF:  { %s258_s29 = smov [#allocation8]   ;;  %s259_s5 = smov [#allocation9]  }
  0x4b   :  { %s127_s30 = sshll.u32 %s258_s29, 4  ;;  %s137_s6 = sshll.u32 %s259_s5, 4  ;;  %s128_s30 = int_to_ptr.vmem [resolvable:$true] %s127_s30  ;;  %s138_s6 = int_to_ptr.vmem [resolvable:$true] %s137_s6 }
  0x4c   :  { %s207_s7 = scalar_lea.vmem %s128_s30, 128  ;;  %p212_p13 = scmp.lt.s32.totalorder %s128_s30, %s128_s30 }
  0x4d   :  { %p208_p12 = scmp.ne.s32.totalorder %s128_s30, %s207_s7  ;;  %p213_p0 = scmp.lt.s32.totalorder %s207_s7, %s207_s7 }
  0x4f   :  { %p214_p1 = por %p213_p0, %p212_p13 }
  0x51   :  { %p215_p2 = pnand %p214_p1, %p208_p12 }
  0x53   :  { %218 = shalt.err (!%p215_p2)
}
  0x54   :  { %130 = dma.vmem_to_hbm [thread:$0]  %s128_s30, 128, %s309_s3, [#allocation5]  }
  0x55   :  { %s227_s9 = scalar_lea.vmem %s138_s6, 128  ;;  %p232_p4 = scmp.lt.s32.totalorder %s138_s6, %s138_s6 }
  0x56   :  { %p228_p3 = scmp.ne.s32.totalorder %s138_s6, %s227_s9  ;;  %p233_p5 = scmp.lt.s32.totalorder %s227_s9, %s227_s9 }
  0x58   :  { %p234_p6 = por %p233_p5, %p232_p4 }
  0x5a   :  { %p235_p7 = pnand %p234_p6, %p228_p3 }
  0x5c   :  { %238 = shalt.err (!%p235_p7)
}
  0x5d   :  { %140 = dma.vmem_to_hbm [thread:$0]  %s138_s6, 128, %s310_s4, [#allocation10]  }
  0x5e   :  { %251 = dma.done.wait [#allocation5], 128  }
  0x5f   :  { %252 = vsyncadd [#allocation5], 4294967168 }
  0x60   :  { %253 = dma.done.wait [#allocation10], 128  }
  0x61   :  { %254 = vsyncadd [#allocation10], 4294967168 }
  0x62   :  { %147 = vsyncpa [#allocation4], 1 }
  0x63   :  { %148 = vsyncpa [#allocation7], 1 }
  0x64   :  { %149 = vsyncpa [#allocation5], 1 }
  0x65   :  { %150 = vsyncpa [#allocation10], 1 }

</bundles_post_ra>
